<compile_context>
chip_gen: v6e
topology: v6e:2x2x1
jax: 0.10.0
libtpu: 0.0.40
codegen_flags: <defaults>
</compile_context>

<pallas_src>
import jax
import jax.numpy as jnp
from jax.experimental import pallas as pl
from jax.experimental.pallas import tpu as pltpu

INPUT_SIZE = 5
HIDDEN = 128
EMBEDDING_SIZE = 16


def _round_up(n, m):
    return ((n + m - 1) // m) * m


def mlp_kernel_t(xT_ref, w1T_ref, b1_ref, w2T_ref, b2_ref, o_ref):
    # Transposed formulation: activations are [features, batch] so the batch
    # (bm) axis sits on the 128-lane axis for loads and fills the MXU N-axis.
    # Explicit bf16 casts pin both matmuls to a single MXU pass; accumulation
    # and bias/ReLU stay in f32.
    x = xT_ref[...].astype(jnp.bfloat16)                                   # [5,   bm]
    w1 = w1T_ref[...].astype(jnp.bfloat16)                                 # [128, 5]
    h = jnp.dot(w1, x, preferred_element_type=jnp.float32)                 # [128, bm]
    h = jnp.maximum(h + b1_ref[...], 0.0).astype(jnp.bfloat16)             # bf16 round-trip
    w2 = w2T_ref[...].astype(jnp.bfloat16)                                 # [16, 128]
    out = jnp.dot(w2, h, preferred_element_type=jnp.float32)               # [16, bm]
    out = out + b2_ref[...]
    # In-kernel transpose (XLU) so the kernel emits [bm, 16] directly and the
    # wrapper needs no extra HBM transpose pass.
    o_ref[...] = jnp.transpose(out).astype(o_ref.dtype)                    # [bm, 16]


def embedding_mlp_forward(x, w1, b1, w2, b2, *, block_m=8192, out_dtype=None):
    """x: [M, 5]. w1: [5,128], b1: [128], w2: [128,16], b2: [16].

    Returns [M, EMBEDDING_SIZE] = relu(x @ w1 + b1) @ w2 + b2, computed with
    bf16 MXU matmuls and f32 accumulation.  Weights are stored [in, out]
    (transposed relative to PyTorch's nn.Linear weight layout).
    """
    M, K = x.shape
    assert K == INPUT_SIZE
    assert block_m % 128 == 0, "block_m must be a multiple of 128 (lane width)"
    out_dtype = x.dtype if out_dtype is None else out_dtype

    # Even-split tiling: waste <128 padded rows per grid step (padded rows are
    # pure wasted MXU cycles since the kernel is compute-bound).
    g = max(1, pl.cdiv(M, block_m))
    # v7x has 2 TensorCores splitting the "parallel" grid axis; avoid a single
    # step when there is enough work to share.
    if g == 1 and M > 256:
        g = 2
    bm = _round_up(pl.cdiv(M, g), 128)
    m_pad = bm * g

    # Lane-dense layout (batch axis last) prepared in the wrapper.
    xT = jnp.transpose(x)                                  # [5,  M]
    if m_pad != M:
        xT = jnp.pad(xT, ((0, 0), (0, m_pad - M)))         # [5,  m_pad]
    w1T = jnp.transpose(w1)                                # [128, 5]
    w2T = jnp.transpose(w2)                                # [16, 128]
    b1c = jnp.reshape(b1, (HIDDEN, 1)).astype(jnp.float32)
    b2c = jnp.reshape(b2, (EMBEDDING_SIZE, 1)).astype(jnp.float32)

    out = pl.pallas_call(
        mlp_kernel_t,
        out_shape=jax.ShapeDtypeStruct((m_pad, EMBEDDING_SIZE), out_dtype),
        grid_spec=pltpu.PrefetchScalarGridSpec(
            num_scalar_prefetch=0,
            grid=(g,),
            in_specs=[
                # batch-tiled, lane-dense input; weights/biases are tiny -> full blocks
                pl.BlockSpec((INPUT_SIZE, bm), lambda i: (0, i)),
                pl.BlockSpec((HIDDEN, INPUT_SIZE), lambda i: (0, 0)),
                pl.BlockSpec((HIDDEN, 1), lambda i: (0, 0)),
                pl.BlockSpec((EMBEDDING_SIZE, HIDDEN), lambda i: (0, 0)),
                pl.BlockSpec((EMBEDDING_SIZE, 1), lambda i: (0, 0)),
            ],
            out_specs=pl.BlockSpec((bm, EMBEDDING_SIZE), lambda i: (i, 0)),
        ),
        compiler_params=pltpu.CompilerParams(
            dimension_semantics=("parallel",),
        ),
    )(xT, w1T, b1c, w2T, b2c)

    return out[:M]                                         # [M, 16]


def get_embeddings(X, w1, b1, w2, b2, *, block_m=8192):
    """X: [N, S, 5] -> [N, S, EMBEDDING_SIZE] (mirrors EmbeddingMLP.get_embeddings)."""
    N, S, _ = X.shape
    stacked = X.reshape(-1, INPUT_SIZE)
    out_stacked = embedding_mlp_forward(stacked, w1, b1, w2, b2, block_m=block_m)
    return out_stacked.reshape(N, S, EMBEDDING_SIZE)


def init_params(key):
    # Deterministic init mimicking nn.Linear's U(-1/sqrt(fan_in), 1/sqrt(fan_in)).
    k1, k2, k3, k4 = jax.random.split(key, 4)
    bound1 = 1.0 / jnp.sqrt(INPUT_SIZE)
    bound2 = 1.0 / jnp.sqrt(HIDDEN)
    # stored as [in, out] (transposed vs. PyTorch's [out, in])
    w1 = jax.random.uniform(k1, (INPUT_SIZE, HIDDEN), jnp.float32, -bound1, bound1)
    b1 = jax.random.uniform(k2, (HIDDEN,), jnp.float32, -bound1, bound1)
    w2 = jax.random.uniform(k3, (HIDDEN, EMBEDDING_SIZE), jnp.float32, -bound2, bound2)
    b2 = jax.random.uniform(k4, (EMBEDDING_SIZE,), jnp.float32, -bound2, bound2)
    return w1, b1, w2, b2


def _reference_f32(x2d, w1, b1, w2, b2):
    h = jnp.maximum(x2d @ w1 + b1[None, :], 0.0)
    return h @ w2 + b2[None, :]


if __name__ == "__main__":
    key = jax.random.PRNGKey(0)
    pkey, xkey, xkey2 = jax.random.split(key, 3)
    w1, b1, w2, b2 = init_params(pkey)

    # bf16 MXU matmuls with f32 accumulation -> compare against the f32
    # reference with a bf16-appropriate tolerance.
    TOL = dict(atol=3e-2, rtol=3e-2)

    # Small example: N=2 sequences of length S=4, each element has 5 features.
    N, S = 2, 4
    X = jax.random.normal(xkey, (N, S, INPUT_SIZE), dtype=jnp.float32)

    out = get_embeddings(X, w1, b1, w2, b2)
    out = jax.block_until_ready(out)

    ref = _reference_f32(X.reshape(-1, INPUT_SIZE), w1, b1, w2, b2).reshape(
        N, S, EMBEDDING_SIZE)
    assert out.shape == (N, S, EMBEDDING_SIZE)
    assert jnp.allclose(out, ref, **TOL)

    # Second check: non-multiple batch that exercises the even-split tiling and
    # the forced 2-step ("parallel") grid for megacore.
    M2 = 300
    X2 = jax.random.normal(xkey2, (M2, INPUT_SIZE), dtype=jnp.float32)
    out2 = jax.block_until_ready(embedding_mlp_forward(X2, w1, b1, w2, b2))
    ref2 = _reference_f32(X2, w1, b1, w2, b2)
    assert out2.shape == (M2, EMBEDDING_SIZE)
    assert jnp.allclose(out2, ref2, **TOL)

    print("KERNEL_OK")
</pallas_src>

<mosaic_0001>
module attributes {stable_mosaic.version = 11 : i64} {
  func.func @mlp_kernel_t(%arg0: i32, %arg1: memref<5x128xf32, #tpu.memory_space<vmem>>, %arg2: memref<128x5xf32, #tpu.memory_space<vmem>>, %arg3: memref<128x1xf32, #tpu.memory_space<vmem>>, %arg4: memref<16x128xf32, #tpu.memory_space<vmem>>, %arg5: memref<16x1xf32, #tpu.memory_space<vmem>>, %arg6: memref<128x16xf32, #tpu.memory_space<vmem>>) attributes {dimension_semantics = [#tpu.dimension_semantics<parallel>], iteration_bounds = array<i64: 1>, scalar_prefetch = 0 : i64, scratch_operands = 0 : i64, tpu.core_type = #tpu.core_type<tc>, window_params = [{transform_indices = @transform_0, window_bounds = array<i64: 5, 128>}, {pipeline_mode = #tpu.pipeline_mode<synchronous>, transform_indices = @transform_1, window_bounds = array<i64: 128, 5>}, {pipeline_mode = #tpu.pipeline_mode<synchronous>, transform_indices = @transform_2, window_bounds = array<i64: 128, 1>}, {pipeline_mode = #tpu.pipeline_mode<synchronous>, transform_indices = @transform_3, window_bounds = array<i64: 16, 128>}, {pipeline_mode = #tpu.pipeline_mode<synchronous>, transform_indices = @transform_4, window_bounds = array<i64: 16, 1>}, {transform_indices = @transform_5, window_bounds = array<i64: 128, 16>}]} {
    %c0 = arith.constant 0 : index
    %c0_0 = arith.constant 0 : index
    %0 = vector.load %arg1[%c0, %c0_0] : memref<5x128xf32, #tpu.memory_space<vmem>>, vector<5x128xf32>
    %1 = arith.truncf %0 : vector<5x128xf32> to vector<5x128xbf16>
    %c0_1 = arith.constant 0 : index
    %c0_2 = arith.constant 0 : index
    %2 = vector.load %arg2[%c0_1, %c0_2] : memref<128x5xf32, #tpu.memory_space<vmem>>, vector<128x5xf32>
    %3 = arith.truncf %2 : vector<128x5xf32> to vector<128x5xbf16>
    %cst = arith.constant dense<0.000000e+00> : vector<128x128xf32>
    %4 = tpu.matmul %3, %1, %cst {dimension_numbers = #tpu.dot_dimension_numbers<[1], [0], [0], [1], [0, 0, 1, 1], [], []>} : vector<128x5xbf16>, vector<5x128xbf16>, vector<128x128xf32> -> vector<128x128xf32>
    %c0_3 = arith.constant 0 : index
    %c0_4 = arith.constant 0 : index
    %5 = vector.load %arg3[%c0_3, %c0_4] : memref<128x1xf32, #tpu.memory_space<vmem>>, vector<128x1xf32>
    %6 = vector.broadcast %5 : vector<128x1xf32> to vector<128x128xf32>
    %7 = arith.addf %4, %6 : vector<128x128xf32>
    %cst_5 = arith.constant 0.000000e+00 : f32
    %8 = vector.broadcast %cst_5 : f32 to vector<128x128xf32>
    %9 = arith.maximumf %7, %8 : vector<128x128xf32>
    %10 = arith.truncf %9 : vector<128x128xf32> to vector<128x128xbf16>
    %c0_6 = arith.constant 0 : index
    %c0_7 = arith.constant 0 : index
    %11 = vector.load %arg4[%c0_6, %c0_7] : memref<16x128xf32, #tpu.memory_space<vmem>>, vector<16x128xf32>
    %12 = arith.truncf %11 : vector<16x128xf32> to vector<16x128xbf16>
    %cst_8 = arith.constant dense<0.000000e+00> : vector<16x128xf32>
    %13 = tpu.matmul %12, %10, %cst_8 {dimension_numbers = #tpu.dot_dimension_numbers<[1], [0], [0], [1], [0, 0, 1, 1], [], []>} : vector<16x128xbf16>, vector<128x128xbf16>, vector<16x128xf32> -> vector<16x128xf32>
    %c0_9 = arith.constant 0 : index
    %c0_10 = arith.constant 0 : index
    %14 = vector.load %arg5[%c0_9, %c0_10] : memref<16x1xf32, #tpu.memory_space<vmem>>, vector<16x1xf32>
    %15 = vector.broadcast %14 : vector<16x1xf32> to vector<16x128xf32>
    %16 = arith.addf %13, %15 : vector<16x128xf32>
    %17 = tpu.transpose %16, [1, 0] : vector<16x128xf32> -> vector<128x16xf32>
    %c0_11 = arith.constant 0 : index
    %c0_12 = arith.constant 0 : index
    %18 = vector.load %arg6[%c0_11, %c0_12] : memref<128x16xf32, #tpu.memory_space<vmem>>, vector<128x16xf32>
    tpu.vector_store %arg6[%c0_11, %c0_12], %17 {strides = array<i32>} : memref<128x16xf32, #tpu.memory_space<vmem>>, vector<128x16xf32>,
    return
  }
  func.func @transform_0(%arg0: i32) -> (i32, i32) {
    %c0_i32 = arith.constant 0 : i32
    %c0_i32_0 = arith.constant 0 : i32
    return %c0_i32, %arg0 : i32, i32
  }
  func.func @transform_1(%arg0: i32) -> (i32, i32) {
    %c0_i32 = arith.constant 0 : i32
    %c0_i32_0 = arith.constant 0 : i32
    %c0_i32_1 = arith.constant 0 : i32
    return %c0_i32, %c0_i32_0 : i32, i32
  }
  func.func @transform_2(%arg0: i32) -> (i32, i32) {
    %c0_i32 = arith.constant 0 : i32
    %c0_i32_0 = arith.constant 0 : i32
    %c0_i32_1 = arith.constant 0 : i32
    return %c0_i32, %c0_i32_0 : i32, i32
  }
  func.func @transform_3(%arg0: i32) -> (i32, i32) {
    %c0_i32 = arith.constant 0 : i32
    %c0_i32_0 = arith.constant 0 : i32
    %c0_i32_1 = arith.constant 0 : i32
    return %c0_i32, %c0_i32_0 : i32, i32
  }
  func.func @transform_4(%arg0: i32) -> (i32, i32) {
    %c0_i32 = arith.constant 0 : i32
    %c0_i32_0 = arith.constant 0 : i32
    %c0_i32_1 = arith.constant 0 : i32
    return %c0_i32, %c0_i32_0 : i32, i32
  }
  func.func @transform_5(%arg0: i32) -> (i32, i32) {
    %c0_i32 = arith.constant 0 : i32
    %c0_i32_0 = arith.constant 0 : i32
    return %arg0, %c0_i32 : i32, i32
  }
}

</mosaic_0001>

<bundles_post_ra>
// kernel: tpu_custom_call.1
= control target key start
LH: loop header
LB: loop body
LE: loop exit
PB: predicated region body
PF: predicated region fallthrough
CT: control target
= control target key end

     0   :  { %vm168_vm0 = vcmask 1041408   ;;  %vm169_vm1 = vcmask 1042432   ;;  %vm143_vm2 = vcmask 39936   ;;  %v475_v1 = vmov 65535   ;;  %s710_s0 = inlined_call_operand.vmem [shape: f32[5,128], index: 0, kind: input, shape index: {}]   ;;  %s711_s1 = inlined_call_operand.vmem [shape: f32[128,5], index: 1, kind: input, shape index: {}]   ;;  %s712_s2 = inlined_call_operand.vmem [shape: f32[128,1], index: 2, kind: input, shape index: {}]   ;;  %s713_s4 = inlined_call_operand.vmem [shape: f32[16,1], index: 4, kind: input, shape index: {}]   ;;  %s714_s3 = inlined_call_operand.vmem [shape: f32[16,128], index: 3, kind: input, shape index: {}]   ;;  %s715_s5 = inlined_call_operand.vmem [shape: f32[128,16], index: 5, kind: output, shape index: {}]  }
   0x1   :  { %v21_v0 = vld [vmem:[%s710_s0] sm:$0x1f]  ;;  %v170_v2 = vsel %vm168_vm0, 4294967295, %v475_v1  ;;  %v24_v4 = vld [vmem:[%s711_s1 + $0x8] sm:$0xff]  ;;  %v476_v8 = vmov 0   ;;  %v25_v9 = vld [vmem:[%s711_s1 + $0x10] sm:$0xff] }
   0x2   :  { %v23_v3 = vld [vmem:[%s711_s1] sm:$0xff]  ;;  %v22_v5 = vpack.c.bf16 %v21_v0, %v21_v0  ;;  %v171_v6 = vsel %vm169_vm1, %v170_v2, 0  ;;  %473 = vset.pattern.permute.xlu0 %v476_v8  ;;  %474 = vset.pattern.permute.xlu1 %v476_v8  ;;  %v26_v10 = vld [vmem:[%s711_s1 + $0x18] sm:$0xff]  ;;  %v28_v13 = vld [vmem:[%s711_s1 + $0x28] sm:$0xff]  ;;  %v477_v49 = vmov 0.0   ;;  %vm478_vm3 = vmmov 0  }
   0x3   :  { %v39_v7 = vpack.c.bf16 %v24_v4, %v23_v3  ;;  %v27_v12 = vld [vmem:[%s711_s1 + $0x20] sm:$0xff]  ;;  %v40_v14 = vpack.c.bf16 %v26_v10, %v25_v9  ;;  %v61_v15 = vld [vmem:[%s712_s2 + $0x70] sm:$0xff]  ;;  %v62_v18 = vld [vmem:[%s712_s2 + $0x78] sm:$0xff]  ;;  %449 = vmatprep.subr.bf16.mxu1 %v477_v49  ;;  %465 = vmatprep.mubr.msk.bf16.mxu1 %vm478_vm3, %v477_v49  ;;  %vm384_vm4 = vcmask 130048  }
   0x4   :  { %v173_v11 = vand.u32 %v171_v6, %v22_v5  ;;  %v41_v16 = vpack.c.bf16 %v28_v13, %v27_v12  ;;  %135 = vperm.xlu0 %473, %v61_v15   ;;  %v59_v17 = vld [vmem:[%s712_s2 + $0x60] sm:$0xff]  ;;  %v60_v19 = vld [vmem:[%s712_s2 + $0x68] sm:$0xff]  ;;  %v29_v20 = vld [vmem:[%s711_s1 + $0x30] sm:$0xff] }
   0x5   :  { %433 = vmatprep.mubr.msk.bf16.mxu0 %vm143_vm2, %v39_v7  ;;  %125 = vperm.xlu1 %474, %v59_v17   ;;  %v30_v21 = vld [vmem:[%s711_s1 + $0x38] sm:$0xff]  ;;  %v31_v22 = vld [vmem:[%s711_s1 + $0x40] sm:$0xff]  ;;  %v32_v23 = vld [vmem:[%s711_s1 + $0x48] sm:$0xff] }
   0x6   :  { %431 = vmatprep.subr.bf16.mxu0 %v173_v11  ;;  %v57_v24 = vld [vmem:[%s712_s2 + $0x50] sm:$0xff]  ;;  %v58_v25 = vld [vmem:[%s712_s2 + $0x58] sm:$0xff]  ;;  %v42_v26 = vpack.c.bf16 %v30_v21, %v29_v20  ;;  %v43_v27 = vpack.c.bf16 %v32_v23, %v31_v22  ;;  %v55_v28 = vld [vmem:[%s712_s2 + $0x40] sm:$0xff] }
   0x7   :  { %432 = vmatpush3.bf16.msra.mxu0 %v173_v11  ;;  %v56_v29 = vld [vmem:[%s712_s2 + $0x48] sm:$0xff]  ;;  %v33_v30 = vld [vmem:[%s711_s1 + $0x50] sm:$0xff]  ;;  %v34_v31 = vld [vmem:[%s711_s1 + $0x58] sm:$0xff] }
   0x8   :  { %140 = vperm.xlu0 %473, %v62_v18   ;;  %v35_v32 = vld [vmem:[%s711_s1 + $0x60] sm:$0xff]  ;;  %v36_v33 = vld [vmem:[%s711_s1 + $0x68] sm:$0xff]  ;;  %v53_v34 = vld [vmem:[%s712_s2 + $0x30] sm:$0xff]  ;;  %v44_v36 = vpack.c.bf16 %v34_v31, %v33_v30 }
   0x9   :  { %130 = vperm.xlu1 %474, %v60_v19   ;;  %v54_v35 = vld [vmem:[%s712_s2 + $0x38] sm:$0xff]  ;;  %v45_v37 = vpack.c.bf16 %v36_v33, %v35_v32  ;;  %v51_v38 = vld [vmem:[%s712_s2 + $0x20] sm:$0xff]  ;;  %v52_v39 = vld [vmem:[%s712_s2 + $0x28] sm:$0xff] }
   0xa   :  { %434 = vmatmul.mubr.msk.bf16.vlgmr.msra.gmra.mxu0 %vm143_vm2, %v40_v14  ;;  %v37_v40 = vld [vmem:[%s711_s1 + $0x70] sm:$0xff]  ;;  %v38_v41 = vld [vmem:[%s711_s1 + $0x78] sm:$0xff]  ;;  %v47_v45 = vld [vmem:[%s712_s2] sm:$0xff] }
   0xb   :  { %437 = vmatprep.mubr.msk.bf16.mxu0 %vm143_vm2, %v41_v16  ;;  %v49_v42 = vld [vmem:[%s712_s2 + $0x10] sm:$0xff]  ;;  %v50_v43 = vld [vmem:[%s712_s2 + $0x18] sm:$0xff]  ;;  %v46_v44 = vpack.c.bf16 %v38_v41, %v37_v40  ;;  %v48_v46 = vld [vmem:[%s712_s2 + $0x8] sm:$0xff] }
   0xc   :  { %115 = vperm.xlu0 %473, %v57_v24   ;;  %v299_v47 = vld [vmem:[%s713_s4] sm:$0xff]  ;;  %v300_v48 = vld [vmem:[%s713_s4 + $0x8] sm:$0xff] }
   0xd   :  { %120 = vperm.xlu1 %474, %v58_v25  }
  0x10   :  { %105 = vperm.xlu0 %473, %v55_v28  }
  0x11   :  { %110 = vperm.xlu1 %474, %v56_v29  }
  0x12   :  { %438 = vmatmul.mubr.msk.bf16.gmra.mxu0 %vm143_vm2, %v42_v26 }
  0x13   :  { %441 = vmatprep.mubr.msk.bf16.mxu0 %vm143_vm2, %v43_v27 }
  0x14   :  { %95 = vperm.xlu0 %473, %v53_v34  }
  0x15   :  { %100 = vperm.xlu1 %474, %v54_v35  }
  0x18   :  { %85 = vperm.xlu0 %473, %v51_v38  }
  0x19   :  { %90 = vperm.xlu1 %474, %v52_v39  }
  0x1a   :  { %442 = vmatmul.mubr.msk.bf16.gmra.mxu0 %vm143_vm2, %v44_v36 }
  0x1b   :  { %445 = vmatprep.mubr.msk.bf16.mxu0 %vm143_vm2, %v45_v37 }
  0x1c   :  { %75 = vperm.xlu0 %473, %v49_v42  }
  0x1d   :  { %80 = vperm.xlu1 %474, %v50_v43  }
  0x20   :  { %65 = vperm.xlu0 %473, %v47_v45  }
  0x21   :  { %70 = vperm.xlu1 %474, %v48_v46  }
  0x22   :  { %446 = vmatmul.mubr.msk.bf16.gmra.mxu0 %vm143_vm2, %v46_v44 }
  0x24   :  { %303 = vperm.xlu0 %473, %v299_v47  }
  0x25   :  { %308 = vperm.xlu1 %474, %v300_v48  }
  0x7f   :  { %v136_v56 = vpop.permute.xlu0 %135 }
  0x80   :  { %v126_v54 = vpop.permute.xlu1 %125 }
  0x83   :  { %v141_v61 = vpop.permute.xlu0 %140 }
  0x84   :  { %v131_v59 = vpop.permute.xlu1 %130 }
  0x87   :  { %v116_v2 = vpop.permute.xlu0 %115 }
  0x88   :  { %v121_v0 = vpop.permute.xlu1 %120 }
  0x8b   :  { %v106_v8 = vpop.permute.xlu0 %105 }
  0x8c   :  { %v111_v5 = vpop.permute.xlu1 %110 }
  0x8f   :  { %v96_v20 = vpop.permute.xlu0 %95 }
  0x90   :  { %v101_v16 = vpop.permute.xlu1 %100 }
  0x93   :  { %v86_v29 = vpop.permute.xlu0 %85 }
  0x94   :  { %v91_v26 = vpop.permute.xlu1 %90 }
  0x97   :  { %v76_v39 = vpop.permute.xlu0 %75 }
  0x98   :  { %v81_v35 = vpop.permute.xlu1 %80 }
  0x9b   :  { %v66_v48 = vpop.permute.xlu0 %65 }
  0x9c   :  { %v71_v45 = vpop.permute.xlu1 %70 }
  0xca   :  { %v624_v50 = vpop.f32.mrf.mxu0 }
  0xcb   :  { %v218_v46 = vadd.f32 %v624_v50, %v76_v39  ;;  %v296_v50 = vld [vmem:[%s714_s3] sm:$0xff] }
  0xcc   :  { %v626_v51 = vpop.f32.mrf.mxu0 }
  0xce   :  { %v436_v52 = vpop.f32.mrf.mxu0 }
  0xcf   :  { %v221_v42 = vadd.f32 %v436_v52, %v81_v35 }
  0xd0   :  { %v628_v53 = vpop.f32.mrf.mxu0 }
  0xd2   :  { %v439_v55 = vpop.f32.mrf.mxu0 }
  0xd3   :  { %v234_v33 = vadd.f32 %v439_v55, %v96_v20  ;;  %v213_v55 = vadd.f32 %v628_v53, %v71_v45 }
  0xd4   :  { %v225_v57 = vpop.f32.mrf.mxu0 }
  0xd5   :  { %v278_v40 = vmax.f32 %v234_v33, 0.0  ;;  %v226_v41 = vadd.f32 %v225_v57, %v86_v29  ;;  %v210_v57 = vadd.f32 %v626_v51, %v66_v48  ;;  %v304_v51 = vpop.permute.xlu0 %303 }
  0xd6   :  { %v440_v58 = vpop.f32.mrf.mxu0 }
  0xd7   :  { %v237_v30 = vadd.f32 %v440_v58, %v101_v16  ;;  %v276_v47 = vmax.f32 %v226_v41, 0.0  ;;  %v274_v58 = vmax.f32 %v218_v46, 0.0 }
  0xd8   :  { %v228_v60 = vpop.f32.mrf.mxu0 }
  0xd9   :  { %v279_v36 = vmax.f32 %v237_v30, 0.0  ;;  %v229_v37 = vadd.f32 %v228_v60, %v91_v26  ;;  %v272_v60 = vmax.f32 %v210_v57, 0.0 }
  0xda   :  { %v443_v62 = vpop.f32.mrf.mxu0 }
  0xdb   :  { %v250_v21 = vadd.f32 %v443_v62, %v116_v2  ;;  %v291_v43 = vpack.c.bf16 %v279_v36, %v278_v40  ;;  %v277_v44 = vmax.f32 %v229_v37, 0.0  ;;  %v309_v2 = vpop.permute.xlu1 %308 }
  0xdc   :  { %v241_v63 = vpop.f32.mrf.mxu0 }
  0xdd   :  { %v282_v27 = vmax.f32 %v250_v21, 0.0  ;;  %v242_v28 = vadd.f32 %v241_v63, %v106_v8 }
  0xde   :  { %v444_v1 = vpop.f32.mrf.mxu0 }
  0xdf   :  { %v253_v17 = vadd.f32 %v444_v1, %v121_v0  ;;  %v280_v34 = vmax.f32 %v242_v28, 0.0 }
  0xe0   :  { %v244_v3 = vpop.f32.mrf.mxu0 }
  0xe1   :  { %v283_v23 = vmax.f32 %v253_v17, 0.0  ;;  %v245_v24 = vadd.f32 %v244_v3, %v111_v5 }
  0xe2   :  { %v447_v4 = vpop.f32.mrf.mxu0 }
  0xe3   :  { %v266_v7 = vadd.f32 %v447_v4, %v136_v56  ;;  %v293_v31 = vpack.c.bf16 %v283_v23, %v282_v27  ;;  %v281_v32 = vmax.f32 %v245_v24, 0.0  ;;  %v290_v56 = vpack.c.bf16 %v277_v44, %v276_v47 }
  0xe4   :  { %v257_v6 = vpop.f32.mrf.mxu0 }
  0xe5   :  { %v286_v12 = vmax.f32 %v266_v7, 0.0  ;;  %v258_v13 = vadd.f32 %v257_v6, %v126_v54  ;;  %v292_v38 = vpack.c.bf16 %v281_v32, %v280_v34  ;;  %v275_v54 = vmax.f32 %v221_v42, 0.0 }
  0xe6   :  { %v448_v9 = vpop.f32.mrf.mxu0 }
  0xe7   :  { %v269_v10 = vadd.f32 %v448_v9, %v141_v61  ;;  %v284_v22 = vmax.f32 %v258_v13, 0.0  ;;  %v289_v52 = vpack.c.bf16 %v275_v54, %v274_v58  ;;  %v297_v61 = vld [vmem:[%s714_s3 + $0x8] sm:$0xff] }
  0xe8   :  { %v260_v11 = vpop.f32.mrf.mxu0  ;;  %v298_v62 = vpack.c.bf16 %v297_v61, %v296_v50 }
  0xe9   :  { %v287_v14 = vmax.f32 %v269_v10, 0.0  ;;  %v261_v15 = vadd.f32 %v260_v11, %v131_v59  ;;  %v273_v59 = vmax.f32 %v213_v55, 0.0 }
  0xeb   :  { %v285_v18 = vmax.f32 %v261_v15, 0.0  ;;  %v295_v19 = vpack.c.bf16 %v287_v14, %v286_v12  ;;  %v288_v53 = vpack.c.bf16 %v273_v59, %v272_v60 }
  0xed   :  { %450 = vmatpush3.bf16.msra.mxu1 %v295_v19  ;;  %v294_v25 = vpack.c.bf16 %v285_v18, %v284_v22 }
  0xee   :  { %451 = vmatprep.subr.bf16.mxu1 %v477_v49 }
  0xf1   :  { %452 = vmatpush3.bf16.msra.mxu1 %v294_v25 }
  0xf2   :  { %453 = vmatprep.subr.bf16.mxu1 %v477_v49 }
  0xf5   :  { %454 = vmatpush3.bf16.msra.mxu1 %v293_v31 }
  0xf6   :  { %455 = vmatprep.subr.bf16.mxu1 %v477_v49 }
  0xf9   :  { %456 = vmatpush3.bf16.msra.mxu1 %v292_v38 }
  0xfa   :  { %457 = vmatprep.subr.bf16.mxu1 %v477_v49 }
  0xfd   :  { %458 = vmatpush3.bf16.msra.mxu1 %v291_v43 }
  0xfe   :  { %459 = vmatprep.subr.bf16.mxu1 %v477_v49 }
 0x101   :  { %460 = vmatpush3.bf16.msra.mxu1 %v290_v56 }
 0x102   :  { %461 = vmatprep.subr.bf16.mxu1 %v477_v49 }
 0x105   :  { %462 = vmatpush3.bf16.msra.mxu1 %v289_v52 }
 0x106   :  { %463 = vmatprep.subr.bf16.mxu1 %v477_v49 }
 0x109   :  { %464 = vmatpush3.bf16.msra.mxu1 %v288_v53 }
 0x10c   :  { %466 = vmatmul.mubr.bf16.vlgmr.msra.gmra.mxu1 %v298_v62 }
 0x1cc   :  { %v345_v63 = vpop.f32.mrf.mxu1 }
 0x1cd   :  { %v346_v0 = vadd.f32 %v345_v63, %v304_v51 }
 0x1ce   :  { %v467_v1 = vpop.f32.mrf.mxu1 }
 0x1cf   :  { %352 = vxpose.xlu0.b32.start [1/2] (short) %v346_v0, 128 }
 0x1d0   :  { %v348_v3 = vpop.f32.mrf.mxu1 }
 0x1d1   :  { %v349_v4 = vadd.f32 %v348_v3, %v309_v2 }
 0x1d2   :  { %v468_v5 = vpop.f32.mrf.mxu1 }
 0x1d3   :  { %353 = vxpose.xlu0.b32.end [2/2] (short) %v349_v4, 128 }
 0x24b   :  { %v368_v6 = vpop.trf.xlu0 }
 0x24c   :  { %385 = vst.msk [vmem:[%s715_s5] sm:$0xff] %vm384_vm4, %v368_v6 }
 0x24f   :  { %v369_v49 = vpop.trf.xlu0 }
 0x250   :  { %386 = vst.msk [vmem:[%s715_s5 + $0x8] sm:$0xff] %vm384_vm4, %v369_v49 }
 0x253   :  { %v370_v7 = vpop.trf.xlu0 }
 0x254   :  { %387 = vst.msk [vmem:[%s715_s5 + $0x10] sm:$0xff] %vm384_vm4, %v370_v7 }
 0x257   :  { %v371_v8 = vpop.trf.xlu0 }
 0x258   :  { %388 = vst.msk [vmem:[%s715_s5 + $0x18] sm:$0xff] %vm384_vm4, %v371_v8 }
 0x25b   :  { %v372_v9 = vpop.trf.xlu0 }
 0x25c   :  { %389 = vst.msk [vmem:[%s715_s5 + $0x20] sm:$0xff] %vm384_vm4, %v372_v9 }
 0x25f   :  { %v373_v10 = vpop.trf.xlu0 }
 0x260   :  { %390 = vst.msk [vmem:[%s715_s5 + $0x28] sm:$0xff] %vm384_vm4, %v373_v10 }
 0x263   :  { %v374_v11 = vpop.trf.xlu0 }
 0x264   :  { %391 = vst.msk [vmem:[%s715_s5 + $0x30] sm:$0xff] %vm384_vm4, %v374_v11 }
 0x267   :  { %v375_v12 = vpop.trf.xlu0 }
 0x268   :  { %392 = vst.msk [vmem:[%s715_s5 + $0x38] sm:$0xff] %vm384_vm4, %v375_v12 }
 0x26b   :  { %v376_v13 = vpop.trf.xlu0 }
 0x26c   :  { %393 = vst.msk [vmem:[%s715_s5 + $0x40] sm:$0xff] %vm384_vm4, %v376_v13 }
 0x26f   :  { %v377_v14 = vpop.trf.xlu0 }
 0x270   :  { %394 = vst.msk [vmem:[%s715_s5 + $0x48] sm:$0xff] %vm384_vm4, %v377_v14 }
 0x273   :  { %v378_v15 = vpop.trf.xlu0 }
 0x274   :  { %395 = vst.msk [vmem:[%s715_s5 + $0x50] sm:$0xff] %vm384_vm4, %v378_v15 }
 0x277   :  { %v379_v16 = vpop.trf.xlu0 }
 0x278   :  { %396 = vst.msk [vmem:[%s715_s5 + $0x58] sm:$0xff] %vm384_vm4, %v379_v16 }
 0x27b   :  { %v380_v17 = vpop.trf.xlu0 }
 0x27c   :  { %397 = vst.msk [vmem:[%s715_s5 + $0x60] sm:$0xff] %vm384_vm4, %v380_v17 }
 0x27f   :  { %v381_v18 = vpop.trf.xlu0 }
 0x280   :  { %398 = vst.msk [vmem:[%s715_s5 + $0x68] sm:$0xff] %vm384_vm4, %v381_v18 }
 0x283   :  { %v382_v19 = vpop.trf.xlu0 }
 0x284   :  { %399 = vst.msk [vmem:[%s715_s5 + $0x70] sm:$0xff] %vm384_vm4, %v382_v19 }
 0x287   :  { %v383_v20 = vpop.trf.xlu0 }
 0x288   :  { %400 = vst.msk [vmem:[%s715_s5 + $0x78] sm:$0xff] %vm384_vm4, %v383_v20 }

</bundles_post_ra>
